<compile_context>
chip_gen: v5e
topology: v5e:2x2
jax: 0.10.0
libtpu: 0.0.40
codegen_flags: <defaults>
</compile_context>

<pallas_src>
import functools

import jax
import jax.numpy as jnp
from jax.experimental import pallas as pl
from jax.experimental.pallas import tpu as pltpu


# --------------------------------------------------------------------------------------
# Shared kernel math: x -> padded head slab y = [adv (cols 0..A-1) | val (col A) | 0...]
# --------------------------------------------------------------------------------------
def _forward_to_head(x_ref, w1_ref, b1_ref, w2_ref, b2_ref, w3_ref, b3_ref,
                     *, split_w2, h1):
    x = x_ref[...]                                                     # bf16 [B, S]

    # layer 1 (both streams at once): [B, S] @ [S, 2*H1] -> f32 [B, 2*H1]
    h = jnp.dot(x, w1_ref[...], preferred_element_type=jnp.float32) + b1_ref[...]
    h = jnp.maximum(h, 0.0)
    hb = h.astype(jnp.bfloat16)

    # layer 2
    if split_w2:
        # v5e-friendly form: two 128x128 matmuls, no zero blocks pushed through the MXU.
        hv = jnp.dot(hb[:, :h1], w2_ref[0], preferred_element_type=jnp.float32)
        ha = jnp.dot(hb[:, h1:], w2_ref[1], preferred_element_type=jnp.float32)
        h2 = jnp.concatenate([hv, ha], axis=-1) + b2_ref[...]
    else:
        # v6e/v7x form: one fused 256-wide block-diagonal matmul (single native MXU tile).
        h2 = jnp.dot(hb, w2_ref[...], preferred_element_type=jnp.float32) + b2_ref[...]
    h2 = jnp.maximum(h2, 0.0)

    # layer 3 / head: [B, 2*H2] @ [2*H2, NPAD] -> f32 [B, NPAD]
    y = jnp.dot(h2.astype(jnp.bfloat16), w3_ref[...],
                preferred_element_type=jnp.float32) + b3_ref[...]
    return y


# Gridless kernel (small batch): global adv.mean() + combine done in-kernel.
def _dueling_small_kernel(x_ref, w1_ref, b1_ref, w2_ref, b2_ref, w3_ref, b3_ref, out_ref,
                          *, split_w2, h1, action_size):
    y = _forward_to_head(x_ref, w1_ref, b1_ref, w2_ref, b2_ref, w3_ref, b3_ref,
                         split_w2=split_w2, h1=h1)
    adv = y[:, :action_size]                                           # lane-0 aligned
    val = y[:, action_size:action_size + 1]
    adv_mean = jnp.mean(adv)          # PyTorch .mean(): global over batch AND action dims
    out_ref[...] = (val + adv - adv_mean).astype(out_ref.dtype)


# Gridded kernel (large batch): emit the lane-dense padded head slab; the global mean and
# the combine happen in an XLA epilogue so batch blocks are fully independent (parallel).
def _dueling_head_kernel(x_ref, w1_ref, b1_ref, w2_ref, b2_ref, w3_ref, b3_ref, y_ref,
                         *, split_w2, h1):
    y = _forward_to_head(x_ref, w1_ref, b1_ref, w2_ref, b2_ref, w3_ref, b3_ref,
                         split_w2=split_w2, h1=h1)
    y_ref[...] = y.astype(y_ref.dtype)


# --------------------------------------------------------------------------------------
# Wrapper
# --------------------------------------------------------------------------------------
def _cost_estimate(batch, state_size, h1, h2, action_size, operands, out_bytes):
    # Useful flops only (the zero blocks of the block-diagonal W2 / padded W3 are excluded).
    flops = 2 * batch * (state_size * 2 * h1 + 2 * h1 * h2 + h2 * (1 + action_size))
    bytes_accessed = sum(int(o.nbytes) for o in operands) + out_bytes
    return pl.CostEstimate(flops=flops, transcendentals=0, bytes_accessed=bytes_accessed)


def dueling_q_forward(x, packed, *, batch_tile=256, grid_threshold=256):
    """x: [B, state_size] float32.  packed: dict from prepare_params()."""
    B, S = x.shape
    A = packed["action_size"]
    h1 = packed["h1"]
    h2 = packed["h2"]
    split_w2 = packed["split_w2"]
    npad = packed["w3"].shape[1]

    xb = x.astype(jnp.bfloat16)

    # ---------------- small batch: gridless, latency-bound path -----------------------
    if B < grid_threshold:
        operands = (xb, packed["w1"], packed["b1"], packed["w2"], packed["b2"],
                    packed["w3"], packed["b3"])
        vmem = pl.BlockSpec(memory_space=pltpu.MemorySpace.VMEM)
        kernel = functools.partial(_dueling_small_kernel,
                                   split_w2=split_w2, h1=h1, action_size=A)
        return pl.pallas_call(
            kernel,
            out_shape=jax.ShapeDtypeStruct((B, A), jnp.float32),
            in_specs=[vmem] * len(operands),
            out_specs=vmem,
            cost_estimate=_cost_estimate(B, S, h1, h2, A, operands, B * A * 4),
        )(*operands)

    # ---------------- large batch: 1-D parallel grid over batch tiles -----------------
    TB = batch_tile
    assert TB % 8 == 0, "batch_tile must be a multiple of 8 (sublane granularity)"
    num_blocks = pl.cdiv(B, TB)
    Bp = num_blocks * TB
    if Bp != B:
        xb = jnp.pad(xb, ((0, Bp - B), (0, 0)))     # zero rows; dropped before the mean

    operands = (xb, packed["w1"], packed["b1"], packed["w2"], packed["b2"],
                packed["w3"], packed["b3"])

    def const_spec(arr):
        shape = arr.shape
        return pl.BlockSpec(shape, lambda i, _n=len(shape): (0,) * _n)

    in_specs = [
        pl.BlockSpec((TB, S), lambda i: (i, 0)),    # x: tiled over batch
        const_spec(packed["w1"]), const_spec(packed["b1"]),   # weights: VMEM-resident
        const_spec(packed["w2"]), const_spec(packed["b2"]),   # (constant block index)
        const_spec(packed["w3"]), const_spec(packed["b3"]),
    ]
    out_specs = pl.BlockSpec((TB, npad), lambda i: (i, 0))    # lane-dense padded slab

    kernel = functools.partial(_dueling_head_kernel, split_w2=split_w2, h1=h1)
    y = pl.pallas_call(
        kernel,
        out_shape=jax.ShapeDtypeStruct((Bp, npad), jnp.float32),
        grid=(num_blocks,),
        in_specs=in_specs,
        out_specs=out_specs,
        compiler_params=pltpu.CompilerParams(
            dimension_semantics=("parallel",)),      # v7x: shard batch across both TCs
        cost_estimate=_cost_estimate(Bp, S, h1, h2, A, operands, Bp * npad * 4),
    )(*operands)

    # Trivial XLA epilogue: global (batch x action) mean + dueling combine.
    y = y[:B]
    adv = y[:, :A]
    val = y[:, A:A + 1]
    return val + adv - jnp.mean(adv)


# --------------------------------------------------------------------------------------
# Parameter init (PyTorch nn.Linear-style) and host-side fusion/packing.
# --------------------------------------------------------------------------------------
def init_params(key, state_size, action_size, hidsize1=128, hidsize2=128):
    """U(-1/sqrt(fan_in), 1/sqrt(fan_in)) init; weights stored [in, out] (pre-transposed)."""
    def linear(k, fan_in, fan_out):
        kw, kb = jax.random.split(k)
        bound = 1.0 / jnp.sqrt(jnp.float32(fan_in))
        w = jax.random.uniform(kw, (fan_in, fan_out), jnp.float32, -bound, bound)
        b = jax.random.uniform(kb, (1, fan_out), jnp.float32, -bound, bound)
        return w, b

    keys = jax.random.split(key, 6)
    w1v, b1v = linear(keys[0], state_size, hidsize1)
    w2v, b2v = linear(keys[1], hidsize1, hidsize2)
    w3v, b3v = linear(keys[2], hidsize2, 1)
    w1a, b1a = linear(keys[3], state_size, hidsize1)
    w2a, b2a = linear(keys[4], hidsize1, hidsize2)
    w3a, b3a = linear(keys[5], hidsize2, action_size)
    return dict(
        w1v=w1v, b1v=b1v, w2v=w2v, b2v=b2v, w3v=w3v, b3v=b3v,
        w1a=w1a, b1a=b1a, w2a=w2a, b2a=b2a, w3a=w3a, b3a=b3a,
    )


def _is_v5e():
    try:
        kind = jax.devices()[0].device_kind.lower()
    except Exception:
        return False
    return ("v5 lite" in kind) or ("v5e" in kind) or ("v5litepod" in kind)


def prepare_params(p, split_w2=None):
    """One-time host-side packing of the two streams into 3 fused (bf16) weight slabs.

    split_w2: pack layer-2 as two [H1,H2] slabs (two 128x128 matmuls) instead of one
              [2H1,2H2] block-diagonal.  Defaults to True on v5e (128x128 MXU), False
              on v6e/v7x (256-wide MXU, single native tile).
    """
    if split_w2 is None:
        split_w2 = _is_v5e()

    h1 = p["w1v"].shape[1]
    h2 = p["w2v"].shape[1]
    a = p["w3a"].shape[1]

    # layer 1: simple concat along the output axis.
    w1 = jnp.concatenate([p["w1v"], p["w1a"]], axis=1)                 # [S, 2*H1]
    b1 = jnp.concatenate([p["b1v"], p["b1a"]], axis=1)                 # [1, 2*H1]

    # layer 2
    if split_w2:
        w2 = jnp.stack([p["w2v"], p["w2a"]], axis=0)                   # [2, H1, H2]
    else:
        w2 = jnp.zeros((2 * h1, 2 * h2), jnp.float32)
        w2 = w2.at[:h1, :h2].set(p["w2v"]).at[h1:, h2:].set(p["w2a"])  # [2*H1, 2*H2]
    b2 = jnp.concatenate([p["b2v"], p["b2a"]], axis=1)                 # [1, 2*H2]

    # layer 3 / head: adv in columns 0..A-1 (lane-0 aligned), val in column A,
    # zero-padded to a multiple of 128 output lanes so the head store is lane-dense.
    npad = max(128, ((a + 1 + 127) // 128) * 128)
    w3 = jnp.zeros((2 * h2, npad), jnp.float32)
    w3 = w3.at[h2:, :a].set(p["w3a"]).at[:h2, a:a + 1].set(p["w3v"])   # [2*H2, NPAD]
    b3 = jnp.zeros((1, npad), jnp.float32)
    b3 = b3.at[:, :a].set(p["b3a"]).at[:, a:a + 1].set(p["b3v"])       # [1, NPAD]

    return dict(
        w1=w1.astype(jnp.bfloat16), b1=b1,
        w2=w2.astype(jnp.bfloat16), b2=b2,
        w3=w3.astype(jnp.bfloat16), b3=b3,
        split_w2=bool(split_w2), h1=int(h1), h2=int(h2), action_size=int(a),
    )


# --------------------------------------------------------------------------------------
# References
# --------------------------------------------------------------------------------------
def _reference_forward_f32(x, p):
    """Pure-f32 JAX reference replicating the PyTorch forward exactly."""
    val = jax.nn.relu(x @ p["w1v"] + p["b1v"])
    val = jax.nn.relu(val @ p["w2v"] + p["b2v"])
    val = val @ p["w3v"] + p["b3v"]
    adv = jax.nn.relu(x @ p["w1a"] + p["b1a"])
    adv = jax.nn.relu(adv @ p["w2a"] + p["b2a"])
    adv = adv @ p["w3a"] + p["b3a"]
    return val + adv - adv.mean()


def _reference_forward_bf16(x, packed):
    """Reference mimicking the kernel's exact bf16-input / f32-accumulate path."""
    f32 = jnp.float32
    h1 = packed["h1"]
    A = packed["action_size"]
    xb = x.astype(jnp.bfloat16).astype(f32)
    h = jax.nn.relu(xb @ packed["w1"].astype(f32) + packed["b1"])
    hb = h.astype(jnp.bfloat16).astype(f32)
    if packed["split_w2"]:
        h2 = jnp.concatenate(
            [hb[:, :h1] @ packed["w2"][0].astype(f32),
             hb[:, h1:] @ packed["w2"][1].astype(f32)], axis=-1) + packed["b2"]
    else:
        h2 = hb @ packed["w2"].astype(f32) + packed["b2"]
    h2 = jax.nn.relu(h2)
    y = h2.astype(jnp.bfloat16).astype(f32) @ packed["w3"].astype(f32) + packed["b3"]
    adv = y[:, :A]
    val = y[:, A:A + 1]
    return val + adv - adv.mean()


# --------------------------------------------------------------------------------------
# Demo / self-test
# --------------------------------------------------------------------------------------
if __name__ == "__main__":
    state_size = 32
    action_size = 8

    key = jax.random.PRNGKey(0)
    kx, kp, kx2 = jax.random.split(key, 3)
    params = init_params(kp, state_size, action_size, hidsize1=128, hidsize2=128)

    # Default packing (fused 256-wide W2 on v6e/v7x; auto-splits on v5e).
    packed = prepare_params(params)

    # 1) Small batch -> gridless, latency-bound path.
    x_small = jax.random.normal(kx, (8, state_size), jnp.float32)
    out_small = jax.block_until_ready(dueling_q_forward(x_small, packed))
    assert out_small.shape == (8, action_size)
    assert jnp.allclose(out_small, _reference_forward_bf16(x_small, packed),
                        atol=2e-3, rtol=2e-3), "small-batch mismatch vs bf16 reference"
    assert jnp.allclose(out_small, _reference_forward_f32(x_small, params),
                        atol=5e-2, rtol=5e-2), "small-batch mismatch vs f32 reference"

    # 2) Forced split-W2 packing (v5e layer-2 form) -> verifies that kernel variant too.
    packed_split = prepare_params(params, split_w2=True)
    out_split = jax.block_until_ready(dueling_q_forward(x_small, packed_split))
    assert jnp.allclose(out_split, _reference_forward_bf16(x_small, packed_split),
                        atol=2e-3, rtol=2e-3), "split-W2 mismatch vs bf16 reference"

    # 3) Larger batch -> gridded, parallel-over-batch path (B=320 exercises tile padding).
    x_big = jax.random.normal(kx2, (320, state_size), jnp.float32)
    out_big = jax.block_until_ready(
        dueling_q_forward(x_big, packed, batch_tile=128, grid_threshold=64))
    assert out_big.shape == (320, action_size)
    assert jnp.allclose(out_big, _reference_forward_bf16(x_big, packed),
                        atol=2e-3, rtol=2e-3), "gridded mismatch vs bf16 reference"
    assert jnp.allclose(out_big, _reference_forward_f32(x_big, params),
                        atol=1e-1, rtol=1e-1), "gridded mismatch vs f32 reference"

    print("KERNEL_OK")
</pallas_src>

<mosaic_0001>
module attributes {stable_mosaic.version = 11 : i64} {
  func.func @_dueling_small_kernel(%arg0: memref<8x32xbf16, #tpu.memory_space<vmem>>, %arg1: memref<32x256xbf16, #tpu.memory_space<vmem>>, %arg2: memref<1x256xf32, #tpu.memory_space<vmem>>, %arg3: memref<256x256xbf16, #tpu.memory_space<vmem>>, %arg4: memref<1x256xf32, #tpu.memory_space<vmem>>, %arg5: memref<256x128xbf16, #tpu.memory_space<vmem>>, %arg6: memref<1x128xf32, #tpu.memory_space<vmem>>, %arg7: memref<8x8xf32, #tpu.memory_space<vmem>>) attributes {dimension_semantics = [], scalar_prefetch = 0 : i64, scratch_operands = 0 : i64, tpu.core_type = #tpu.core_type<tc>} {
    %c0 = arith.constant 0 : index
    %c0_0 = arith.constant 0 : index
    %0 = vector.load %arg0[%c0, %c0_0] : memref<8x32xbf16, #tpu.memory_space<vmem>>, vector<8x32xbf16>
    %c0_1 = arith.constant 0 : index
    %c0_2 = arith.constant 0 : index
    %1 = vector.load %arg1[%c0_1, %c0_2] : memref<32x256xbf16, #tpu.memory_space<vmem>>, vector<32x256xbf16>
    %cst = arith.constant dense<0.000000e+00> : vector<8x256xf32>
    %2 = tpu.matmul %0, %1, %cst {dimension_numbers = #tpu.dot_dimension_numbers<[1], [0], [0], [1], [0, 0, 1, 1], [], []>} : vector<8x32xbf16>, vector<32x256xbf16>, vector<8x256xf32> -> vector<8x256xf32>
    %c0_3 = arith.constant 0 : index
    %c0_4 = arith.constant 0 : index
    %3 = vector.load %arg2[%c0_3, %c0_4] : memref<1x256xf32, #tpu.memory_space<vmem>>, vector<1x256xf32>
    %4 = vector.broadcast %3 : vector<1x256xf32> to vector<8x256xf32>
    %5 = arith.addf %2, %4 : vector<8x256xf32>
    %cst_5 = arith.constant 0.000000e+00 : f32
    %6 = vector.broadcast %cst_5 : f32 to vector<8x256xf32>
    %7 = arith.maximumf %5, %6 : vector<8x256xf32>
    %8 = arith.truncf %7 : vector<8x256xf32> to vector<8x256xbf16>
    %c0_6 = arith.constant 0 : index
    %c0_7 = arith.constant 0 : index
    %9 = vector.load %arg3[%c0_6, %c0_7] : memref<256x256xbf16, #tpu.memory_space<vmem>>, vector<256x256xbf16>
    %cst_8 = arith.constant dense<0.000000e+00> : vector<8x256xf32>
    %10 = tpu.matmul %8, %9, %cst_8 {dimension_numbers = #tpu.dot_dimension_numbers<[1], [0], [0], [1], [0, 0, 1, 1], [], []>} : vector<8x256xbf16>, vector<256x256xbf16>, vector<8x256xf32> -> vector<8x256xf32>
    %c0_9 = arith.constant 0 : index
    %c0_10 = arith.constant 0 : index
    %11 = vector.load %arg4[%c0_9, %c0_10] : memref<1x256xf32, #tpu.memory_space<vmem>>, vector<1x256xf32>
    %12 = vector.broadcast %11 : vector<1x256xf32> to vector<8x256xf32>
    %13 = arith.addf %10, %12 : vector<8x256xf32>
    %cst_11 = arith.constant 0.000000e+00 : f32
    %14 = vector.broadcast %cst_11 : f32 to vector<8x256xf32>
    %15 = arith.maximumf %13, %14 : vector<8x256xf32>
    %16 = arith.truncf %15 : vector<8x256xf32> to vector<8x256xbf16>
    %c0_12 = arith.constant 0 : index
    %c0_13 = arith.constant 0 : index
    %17 = vector.load %arg5[%c0_12, %c0_13] : memref<256x128xbf16, #tpu.memory_space<vmem>>, vector<256x128xbf16>
    %cst_14 = arith.constant dense<0.000000e+00> : vector<8x128xf32>
    %18 = tpu.matmul %16, %17, %cst_14 {dimension_numbers = #tpu.dot_dimension_numbers<[1], [0], [0], [1], [0, 0, 1, 1], [], []>} : vector<8x256xbf16>, vector<256x128xbf16>, vector<8x128xf32> -> vector<8x128xf32>
    %c0_15 = arith.constant 0 : index
    %c0_16 = arith.constant 0 : index
    %19 = vector.load %arg6[%c0_15, %c0_16] : memref<1x128xf32, #tpu.memory_space<vmem>>, vector<1x128xf32>
    %20 = vector.broadcast %19 : vector<1x128xf32> to vector<8x128xf32>
    %21 = arith.addf %18, %20 : vector<8x128xf32>
    %22 = vector.extract_strided_slice %21 {offsets = [0, 0], sizes = [8, 8], strides = [1, 1]} : vector<8x128xf32> to vector<8x8xf32>
    %23 = vector.extract_strided_slice %21 {offsets = [0, 8], sizes = [8, 1], strides = [1, 1]} : vector<8x128xf32> to vector<8x1xf32>
    %24 = vector.shape_cast %22 : vector<8x8xf32> to vector<1x8x8xf32>
    %cst_17 = arith.constant dense<0.000000e+00> : vector<1xf32>
    %25 = vector.multi_reduction <add>, %24, %cst_17 [1, 2] : vector<1x8x8xf32> to vector<1xf32>
    %26 = vector.shape_cast %25 : vector<1xf32> to vector<1x1x1xf32>
    %27 = vector.extract %26[0, 0, 0] : f32 from vector<1x1x1xf32>
    %cst_18 = arith.constant 6.400000e+01 : f32
    %28 = arith.divf %27, %cst_18 : f32
    %29 = vector.broadcast %23 : vector<8x1xf32> to vector<8x8xf32>
    %30 = arith.addf %29, %22 : vector<8x8xf32>
    %31 = vector.broadcast %28 : f32 to vector<8x8xf32>
    %32 = arith.subf %30, %31 : vector<8x8xf32>
    %c0_19 = arith.constant 0 : index
    %c0_20 = arith.constant 0 : index
    %33 = vector.load %arg7[%c0_19, %c0_20] : memref<8x8xf32, #tpu.memory_space<vmem>>, vector<8x8xf32>
    tpu.vector_store %arg7[%c0_19, %c0_20], %32 {strides = array<i32>} : memref<8x8xf32, #tpu.memory_space<vmem>>, vector<8x8xf32>,
    return
  }
}

</mosaic_0001>

<bundles_post_ra>
// kernel: tpu_custom_call.1
= control target key start
LH: loop header
LB: loop body
LE: loop exit
PB: predicated region body
PF: predicated region fallthrough
CT: control target
= control target key end

     0   :  { %12 = vsyncpa [#allocation3], 0  ;;  %s1141_s0 = inlined_call_operand.hbm [shape: bf16[8,32], index: 0, kind: input, shape index: {}]   ;;  %s1142_s1 = inlined_call_operand.hbm [shape: bf16[32,256], index: 1, kind: input, shape index: {}]   ;;  %s1143_s2 = inlined_call_operand.hbm [shape: f32[1,256], index: 2, kind: input, shape index: {}]   ;;  %s1144_s3 = inlined_call_operand.hbm [shape: bf16[256,256], index: 3, kind: input, shape index: {}]   ;;  %s1145_s4 = inlined_call_operand.vmem [shape: f32[1,256], index: 4, kind: input, shape index: {}]   ;;  %s1146_s5 = inlined_call_operand.hbm [shape: bf16[256,128], index: 5, kind: input, shape index: {}]   ;;  %s1147_s6 = inlined_call_operand.vmem [shape: f32[1,128], index: 6, kind: input, shape index: {}]   ;;  %s1148_s7 = inlined_call_operand.hbm [shape: f32[8,8], index: 7, kind: output, shape index: {}]  }
   0x1   :  { %13 = vsyncpa [#allocation6], 0 }
   0x2   :  { %14 = vsyncpa [#allocation9], 0  ;;  %s31_s26 = sshll.u32 %s1142_s1, 4  ;;  %s32_s26 = int_to_ptr.hbm [resolvable:$true] %s31_s26 }
   0x3   :  { %15 = vsyncpa [#allocation4], 0  ;;  %s1061_s27 = smov [#allocation5]   ;;  %s55_s8 = sshll.u32 %s1144_s3, 4  ;;  %s56_s8 = int_to_ptr.hbm [resolvable:$true] %s55_s8 }
   0x4   :  { %s33_s28 = sshll.u32 %s1061_s27, 4  ;;  %s1062_s9 = smov 128   ;;  %s34_s28 = int_to_ptr.vmem [resolvable:$true] %s33_s28 }
   0x5   :  { %s1063_s10 = smov 8   ;;  %s1064_s11 = smov [#allocation8]  }
   0x6   :  { %39 = dma.hbm_to_vmem [thread:$0]  %s32_s26, 512, %s34_s28, [#allocation6], %s1062_s9, %s1062_s9, %s1063_s10  }
   0x7   :  { %s57_s12 = sshll.u32 %s1064_s11, 4  ;;  %s21_s15 = sshll.u32 %s1141_s0, 4  ;;  %s58_s12 = int_to_ptr.vmem [resolvable:$true] %s57_s12  ;;  %s22_s15 = int_to_ptr.hbm [resolvable:$true] %s21_s15 }
   0x8   :  { %63 = dma.hbm_to_vmem [thread:$0]  %s56_s8, 4096, %s58_s12, [#allocation9], %s1062_s9, %s1062_s9, %s1063_s10  }
   0x9   :  { %s45_s17 = sshll.u32 %s1143_s2, 4  ;;  %s1065_s18 = smov [#allocation2]   ;;  %s46_s17 = int_to_ptr.hbm [resolvable:$true] %s45_s17 }
   0xa   :  { %s23_s19 = sshll.u32 %s1065_s18, 4  ;;  %s1066_s3 = smov [#allocation7]   ;;  %s24_s19 = int_to_ptr.vmem [resolvable:$true] %s23_s19 }
   0xb   :  { %26 = dma.hbm_to_vmem [thread:$0]  %s22_s15, 64, %s24_s19, [#allocation3]  }
   0xc   :  { %s47_s20 = sshll.u32 %s1066_s3, 4  ;;  %s70_s23 = sshll.u32 %s1146_s5, 4  ;;  %s48_s20 = int_to_ptr.vmem [resolvable:$true] %s47_s20  ;;  %s71_s23 = int_to_ptr.hbm [resolvable:$true] %s70_s23 }
   0xd   :  { %50 = dma.hbm_to_vmem [thread:$0]  %s46_s17, 32, %s48_s20, [#allocation6]  }
   0xe   :  { %s1067_s0 = smov [#allocation10]   ;;  %s1068_s25 = smov 64  }
   0xf   :  { %s72_s24 = sshll.u32 %s1067_s0, 4  ;;  %s1069_s26 = smov 4   ;;  %s73_s24 = int_to_ptr.vmem [resolvable:$true] %s72_s24 }
  0x10   :  { %78 = dma.hbm_to_vmem [thread:$0]  %s71_s23, 2048, %s73_s24, [#allocation9], %s1068_s25, %s1068_s25, %s1069_s26  }
  0x11   :  { %1053 = dma.done.wait [#allocation3], 64  }
  0x12   :  { %1054 = vsyncadd [#allocation3], 4294967232 }
  0x13   :  { %1055 = dma.done.wait [#allocation6], 544  }
  0x14   :  { %1056 = vsyncadd [#allocation6], 4294966752 }
  0x15   :  { %1057 = dma.done.wait [#allocation9], 6144  }
  0x16   :  { %1058 = vsyncadd [#allocation9], 4294961152  ;;  %v637_v0 = vld [vmem:[#allocation5 + $0x10] sm:$0xf]  ;;  %v840_v1 = vld [vmem:[#allocation5 + $0x14] sm:$0xf0] }
  0x17   :  { %v839_v2 = vld [vmem:[#allocation5 + $0x14] sm:$0xf]  ;;  %v638_v3 = vor.u32 %v840_v1, %v637_v0  ;;  %v639_v4 = vld [vmem:[#allocation5 + $0x18] sm:$0xf0]  ;;  %v629_v5 = vld [vmem:[#allocation5] sm:$0xf] }
  0x18   :  { %v838_v6 = vld [vmem:[#allocation5 + $0x4] sm:$0xf0]  ;;  %v642_v7 = vor.u32 %v839_v2, %v639_v4  ;;  %v837_v8 = vld [vmem:[#allocation5 + $0x4] sm:$0xf]  ;;  %v631_v9 = vld [vmem:[#allocation5 + $0x8] sm:$0xf0] }
  0x19   :  { %vm133_vm0 = vcmask 261120   ;;  %143 = vmatpush.bf16.msra.mxu0 %v638_v3  ;;  %v630_v10 = vor.u32 %v838_v6, %v629_v5  ;;  %v703_v11 = vld [vmem:[#allocation8 + $0x70] sm:$0xf]  ;;  %v856_v12 = vld [vmem:[#allocation8 + $0x74] sm:$0xf0]  ;;  %v634_v14 = vor.u32 %v837_v8, %v631_v9  ;;  %vm579_vm1 = vcmask 64512  }
  0x1a   :  { %v767_v13 = vld [vmem:[#allocation8 + $0xf0] sm:$0xf]  ;;  %156 = vmatpush.bf16.msra.mxu1 %v642_v7  ;;  %v704_v15 = vor.u32 %v856_v12, %v703_v11  ;;  %v872_v16 = vld [vmem:[#allocation8 + $0xf4] sm:$0xf0]  ;;  %v855_v17 = vld [vmem:[#allocation8 + $0x74] sm:$0xf] }
  0x1b   :  { %v705_v18 = vld [vmem:[#allocation8 + $0x78] sm:$0xf0]  ;;  %v768_v20 = vor.u32 %v872_v16, %v767_v13  ;;  %v871_v22 = vld [vmem:[#allocation8 + $0xf4] sm:$0xf]  ;;  %v695_v24 = vld [vmem:[#allocation8 + $0x60] sm:$0xf] }
  0x1c   :  { %v102_v19 = vld [vmem:[#allocation2] sm:$0xf]  ;;  %v708_v21 = vor.u32 %v855_v17, %v705_v18  ;;  %365 = vmatpush.bf16.msra.mxu2 %v704_v15  ;;  %v854_v26 = vld [vmem:[#allocation8 + $0x64] sm:$0xf0]  ;;  %v759_v27 = vld [vmem:[#allocation8 + $0xe0] sm:$0xf] }
  0x1d   :  { %v769_v23 = vld [vmem:[#allocation8 + $0xf8] sm:$0xf0]  ;;  %v870_v28 = vld [vmem:[#allocation8 + $0xe4] sm:$0xf0]  ;;  %144 = vmatpush.bf16.msra.mxu0 %v630_v10  ;;  %378 = vmatpush.bf16.msra.mxu3 %v768_v20  ;;  %v696_v29 = vor.u32 %v854_v26, %v695_v24  ;;  %v853_v31 = vld [vmem:[#allocation8 + $0x64] sm:$0xf] }
  0x1e   :  { %v772_v25 = vor.u32 %v871_v22, %v769_v23  ;;  %v760_v30 = vor.u32 %v870_v28, %v759_v27  ;;  %v697_v32 = vld [vmem:[#allocation8 + $0x68] sm:$0xf0]  ;;  %v869_v33 = vld [vmem:[#allocation8 + $0xe4] sm:$0xf]  ;;  %157 = vmatpush.bf16.msra.mxu1 %v634_v14  ;;  %v687_v36 = vld [vmem:[#allocation8 + $0x50] sm:$0xf] }
  0x1f   :  { %v700_v34 = vor.u32 %v853_v31, %v697_v32  ;;  %v761_v35 = vld [vmem:[#allocation8 + $0xe8] sm:$0xf0]  ;;  %v852_v37 = vld [vmem:[#allocation8 + $0x54] sm:$0xf0]  ;;  %v751_v39 = vld [vmem:[#allocation8 + $0xd0] sm:$0xf] }
  0x20   :  { %v764_v38 = vor.u32 %v869_v33, %v761_v35  ;;  %v868_v40 = vld [vmem:[#allocation8 + $0xd4] sm:$0xf0]  ;;  %v851_v41 = vld [vmem:[#allocation8 + $0x54] sm:$0xf]  ;;  %643 = vmatmul.msk.bf16.vlgmr.msra.gmra.mxu0 %vm133_vm0, %v102_v19  ;;  %366 = vmatpush.bf16.msra.mxu2 %v696_v29  ;;  %v688_v42 = vor.u32 %v852_v37, %v687_v36  ;;  %v689_v43 = vld [vmem:[#allocation8 + $0x58] sm:$0xf0] }
  0x21   :  { %391 = vmatpush.bf16.msrb.mxu0 %v708_v21  ;;  %v867_v44 = vld [vmem:[#allocation8 + $0xd4] sm:$0xf]  ;;  %v753_v45 = vld [vmem:[#allocation8 + $0xd8] sm:$0xf0]  ;;  %644 = vmatmul.msk.bf16.vlgmr.msra.gmra.mxu1 %vm133_vm0, %v102_v19  ;;  %v752_v46 = vor.u32 %v868_v40, %v751_v39  ;;  %v679_v47 = vld [vmem:[#allocation8 + $0x40] sm:$0xf]  ;;  %v692_v49 = vor.u32 %v851_v41, %v689_v43 }
  0x22   :  { %404 = vmatpush.bf16.msrb.mxu1 %v772_v25  ;;  %379 = vmatpush.bf16.msra.mxu3 %v760_v30  ;;  %v850_v48 = vld [vmem:[#allocation8 + $0x44] sm:$0xf0]  ;;  %v743_v50 = vld [vmem:[#allocation8 + $0xc0] sm:$0xf]  ;;  %v756_v52 = vor.u32 %v867_v44, %v753_v45  ;;  %v849_v53 = vld [vmem:[#allocation8 + $0x44] sm:$0xf] }
  0x23   :  { %v866_v51 = vld [vmem:[#allocation8 + $0xc4] sm:$0xf0]  ;;  %v681_v54 = vld [vmem:[#allocation8 + $0x48] sm:$0xf0]  ;;  %v680_v55 = vor.u32 %v850_v48, %v679_v47  ;;  %v865_v56 = vld [vmem:[#allocation8 + $0xc4] sm:$0xf] }
  0x24   :  { %367 = vmatpush.bf16.msra.mxu2 %v688_v42  ;;  %v745_v57 = vld [vmem:[#allocation8 + $0xc8] sm:$0xf0]  ;;  %v744_v58 = vor.u32 %v866_v51, %v743_v50  ;;  %v671_v59 = vld [vmem:[#allocation8 + $0x30] sm:$0xf]  ;;  %v848_v60 = vld [vmem:[#allocation8 + $0x34] sm:$0xf0]  ;;  %v684_v61 = vor.u32 %v849_v53, %v681_v54 }
  0x25   :  { %392 = vmatpush.bf16.msrb.mxu0 %v700_v34  ;;  %v735_v62 = vld [vmem:[#allocation8 + $0xb0] sm:$0xf]  ;;  %v864_v63 = vld [vmem:[#allocation8 + $0xb4] sm:$0xf0]  ;;  %v748_v0 = vor.u32 %v865_v56, %v745_v57  ;;  %v847_v1 = vld [vmem:[#allocation8 + $0x34] sm:$0xf]  ;;  %v672_v3 = vor.u32 %v848_v60, %v671_v59 }
  0x26   :  { %405 = vmatpush.bf16.msrb.mxu1 %v764_v38  ;;  %380 = vmatpush.bf16.msra.mxu3 %v752_v46  ;;  %v673_v2 = vld [vmem:[#allocation8 + $0x38] sm:$0xf0]  ;;  %v863_v4 = vld [vmem:[#allocation8 + $0xb4] sm:$0xf]  ;;  %v736_v6 = vor.u32 %v864_v63, %v735_v62  ;;  %v663_v7 = vld [vmem:[#allocation8 + $0x20] sm:$0xf] }
  0x27   :  { %v737_v5 = vld [vmem:[#allocation8 + $0xb8] sm:$0xf0]  ;;  %v846_v8 = vld [vmem:[#allocation8 + $0x24] sm:$0xf0]  ;;  %v676_v9 = vor.u32 %v847_v1, %v673_v2  ;;  %v727_v10 = vld [vmem:[#allocation8 + $0xa0] sm:$0xf] }
  0x28   :  { %368 = vmatpush.bf16.msra.mxu2 %v680_v55  ;;  %v862_v11 = vld [vmem:[#allocation8 + $0xa4] sm:$0xf0]  ;;  %v740_v12 = vor.u32 %v863_v4, %v737_v5  ;;  %v845_v13 = vld [vmem:[#allocation8 + $0x24] sm:$0xf]  ;;  %v665_v14 = vld [vmem:[#allocation8 + $0x28] sm:$0xf0]  ;;  %v664_v15 = vor.u32 %v846_v8, %v663_v7 }
  0x29   :  { %393 = vmatpush.bf16.msrb.mxu0 %v692_v49  ;;  %v861_v16 = vld [vmem:[#allocation8 + $0xa4] sm:$0xf]  ;;  %v729_v17 = vld [vmem:[#allocation8 + $0xa8] sm:$0xf0]  ;;  %v728_v18 = vor.u32 %v862_v11, %v727_v10  ;;  %v668_v19 = vor.u32 %v845_v13, %v665_v14  ;;  %v655_v21 = vld [vmem:[#allocation8 + $0x10] sm:$0xf] }
  0x2a   :  { %406 = vmatpush.bf16.msrb.mxu1 %v756_v52  ;;  %381 = vmatpush.bf16.msra.mxu3 %v744_v58  ;;  %v732_v20 = vor.u32 %v861_v16, %v729_v17  ;;  %v844_v22 = vld [vmem:[#allocation8 + $0x14] sm:$0xf0]  ;;  %v719_v23 = vld [vmem:[#allocation8 + $0x90] sm:$0xf]  ;;  %v843_v26 = vld [vmem:[#allocation8 + $0x14] sm:$0xf] }
  0x2b   :  { %v656_v24 = vor.u32 %v844_v22, %v655_v21  ;;  %v860_v25 = vld [vmem:[#allocation8 + $0x94] sm:$0xf0]  ;;  %v657_v27 = vld [vmem:[#allocation8 + $0x18] sm:$0xf0]  ;;  %v859_v30 = vld [vmem:[#allocation8 + $0x94] sm:$0xf] }
  0x2c   :  { %369 = vmatpush.bf16.msra.mxu2 %v672_v3  ;;  %v720_v28 = vor.u32 %v860_v25, %v719_v23  ;;  %v660_v29 = vor.u32 %v843_v26, %v657_v27  ;;  %v721_v31 = vld [vmem:[#allocation8 + $0x98] sm:$0xf0]  ;;  %v647_v33 = vld [vmem:[#allocation8] sm:$0xf]  ;;  %v842_v34 = vld [vmem:[#allocation8 + $0x4] sm:$0xf0] }
  0x2d   :  { %394 = vmatpush.bf16.msrb.mxu0 %v684_v61  ;;  %v724_v32 = vor.u32 %v859_v30, %v721_v31  ;;  %v711_v35 = vld [vmem:[#allocation8 + $0x80] sm:$0xf]  ;;  %v648_v36 = vor.u32 %v842_v34, %v647_v33  ;;  %v858_v37 = vld [vmem:[#allocation8 + $0x84] sm:$0xf0]  ;;  %v841_v38 = vld [vmem:[#allocation8 + $0x4] sm:$0xf] }
  0x2e   :  { %407 = vmatpush.bf16.msrb.mxu1 %v748_v0  ;;  %382 = vmatpush.bf16.msra.mxu3 %v736_v6  ;;  %v649_v39 = vld [vmem:[#allocation8 + $0x8] sm:$0xf0]  ;;  %v712_v40 = vor.u32 %v858_v37, %v711_v35  ;;  %v857_v42 = vld [vmem:[#allocation8 + $0x84] sm:$0xf]  ;;  %v888_v45 = vld [vmem:[#allocation10 + $0x78] sm:$0xff]  ;;  %s1072_s29 = smov [#allocation11]  }
  0x2f   :  { %v652_v41 = vor.u32 %v841_v38, %v649_v39  ;;  %v713_v43 = vld [vmem:[#allocation8 + $0x88] sm:$0xf0]  ;;  %v880_v46 = vld [vmem:[#allocation10 + $0x38] sm:$0xff]  ;;  %v887_v47 = vld [vmem:[#allocation10 + $0x70] sm:$0xff]  ;;  %v1071_v38 = vmov 64.0   ;;  %s613_s30 = sshll.u32 %s1072_s29, 4  ;;  %s614_s30 = int_to_ptr.vmem [resolvable:$true] %s613_s30 }
  0x30   :  { %370 = vmatpush.bf16.msra.mxu2 %v664_v15  ;;  %v716_v44 = vor.u32 %v857_v42, %v713_v43  ;;  %v879_v48 = vld [vmem:[#allocation10 + $0x30] sm:$0xff]  ;;  %v886_v49 = vld [vmem:[#allocation10 + $0x68] sm:$0xff]  ;;  %v885_v51 = vld [vmem:[#allocation10 + $0x60] sm:$0xff]  ;;  %907 = vrcp.f32 %v1071_v38  ;;  %s615_s11 = sshll.u32 %s1148_s7, 4  ;;  %s616_s11 = int_to_ptr.hbm [resolvable:$true] %s615_s11 }
  0x31   :  { %395 = vmatpush.bf16.msrb.mxu0 %v676_v9  ;;  %v878_v50 = vld [vmem:[#allocation10 + $0x28] sm:$0xff]  ;;  %v877_v52 = vld [vmem:[#allocation10 + $0x20] sm:$0xff]  ;;  %v884_v53 = vld [vmem:[#allocation10 + $0x58] sm:$0xff] }
  0x32   :  { %408 = vmatpush.bf16.msrb.mxu1 %v740_v12  ;;  %383 = vmatpush.bf16.msra.mxu3 %v728_v18  ;;  %v107_v54 = vld [vmem:[#allocation7] sm:$0x3]  ;;  %v883_v55 = vld [vmem:[#allocation10 + $0x50] sm:$0xff]  ;;  %v882_v5 = vld [vmem:[#allocation10 + $0x48] sm:$0xff] }
  0x33   :  { %v109_v56 = vperm.slane %v107_v54, 0  ;;  %v110_v57 = vperm.slane %v107_v54, 1  ;;  %v876_v4 = vld [vmem:[#allocation10 + $0x18] sm:$0xff]  ;;  %v875_v6 = vld [vmem:[#allocation10 + $0x10] sm:$0xff]  ;;  %v881_v7 = vld [vmem:[#allocation10 + $0x40] sm:$0xff] }
  0x34   :  { %371 = vmatpush.bf16.msra.mxu2 %v656_v24  ;;  %v874_v8 = vld [vmem:[#allocation10 + $0x8] sm:$0xff]  ;;  %v873_v9 = vld [vmem:[#allocation10] sm:$0xff]  ;;  %v199_v10 = vld [vmem:[%s1145_s4] sm:$0x3] }
  0x35   :  { %396 = vmatpush.bf16.msrb.mxu0 %v668_v19  ;;  %v202_v11 = vperm.slane %v199_v10, 1  ;;  %v201_v16 = vperm.slane %v199_v10, 0  ;;  %v906_v31 = vld [vmem:[%s1147_s6] ss:$0 sm:$0xff] }
  0x36   :  { %409 = vmatpush.bf16.msrb.mxu1 %v732_v20  ;;  %384 = vmatpush.bf16.msra.mxu3 %v720_v28  ;;  %v908_v39 = vpop.eup %907 }
  0x37   :  { %vm595_vm2 = vweird.f32 %v908_v39 }
  0x38   :  { %372 = vmatpush.bf16.msra.mxu2 %v648_v36 }
  0x39   :  { %397 = vmatpush.bf16.msrb.mxu0 %v660_v29  ;;  %v1070_v29 = vmov 8  }
  0x3a   :  { %410 = vmatpush.bf16.msrb.mxu1 %v724_v32  ;;  %385 = vmatpush.bf16.msra.mxu3 %v712_v40  ;;  %v591_v40 = vmul.f32 64.0, %v908_v39 }
  0x3b   :  { %905 = vset.pattern.permute.xlu0 %v1070_v29 }
  0x3c   :  { %553 = vmatpush.bf16.msrb.mxu2 %v880_v46 }
  0x3d   :  { %398 = vmatpush.bf16.msrb.mxu0 %v652_v41  ;;  %v592_v41 = vsub.f32 1.0, %v591_v40 }
  0x3e   :  { %411 = vmatpush.bf16.msrb.mxu1 %v716_v44  ;;  %566 = vmatpush.bf16.msrb.mxu3 %v888_v45 }
  0x3f   :  { %v593_v45 = vmul.f32 %v908_v39, %v592_v41 }
  0x40   :  { %554 = vmatpush.bf16.msrb.mxu2 %v879_v48 }
  0x41   :  { %v594_v48 = vadd.f32 %v908_v39, %v593_v45 }
  0x42   :  { %567 = vmatpush.bf16.msrb.mxu3 %v887_v47 }
  0x44   :  { %555 = vmatpush.bf16.msrb.mxu2 %v878_v50 }
  0x46   :  { %568 = vmatpush.bf16.msrb.mxu3 %v886_v49 }
  0x48   :  { %556 = vmatpush.bf16.msrb.mxu2 %v877_v52 }
  0x4a   :  { %569 = vmatpush.bf16.msrb.mxu3 %v885_v51  ;;  %v596_v51 = vsel %vm595_vm2, %v908_v39, %v594_v48 }
  0x4c   :  { %557 = vmatpush.bf16.msrb.mxu2 %v876_v4 }
  0x4e   :  { %570 = vmatpush.bf16.msrb.mxu3 %v884_v53 }
  0x50   :  { %558 = vmatpush.bf16.msrb.mxu2 %v875_v6 }
  0x52   :  { %571 = vmatpush.bf16.msrb.mxu3 %v883_v55 }
  0x54   :  { %559 = vmatpush.bf16.msrb.mxu2 %v874_v8 }
  0x56   :  { %572 = vmatpush.bf16.msrb.mxu3 %v882_v5 }
  0x58   :  { %560 = vmatpush.bf16.msrb.mxu2 %v873_v9 }
  0x5a   :  { %573 = vmatpush.bf16.msrb.mxu3 %v881_v7 }
  0x9d   :  { %v146_v58 = vpop.f32.mrf.mxu0 }
  0x9e   :  { %v147_v59 = vadd.f32 %v146_v58, %v109_v56  ;;  %v159_v60 = vpop.f32.mrf.mxu1 }
  0x9f   :  { %v160_v61 = vadd.f32 %v159_v60, %v110_v57 }
  0xa0   :  { %v163_v62 = vmax.f32 %v147_v59, 0.0 }
  0xa1   :  { %v164_v63 = vmax.f32 %v160_v61, 0.0 }
  0xa2   :  { %v165_v0 = vpack.c.bf16 %v163_v62, %v163_v62 }
  0xa3   :  { %v166_v1 = vpack.c.bf16 %v164_v63, %v164_v63 }
  0xa4   :  { %373 = vmatmul.bf16.vlgmr.msra.gmra.mxu2 %v165_v0  ;;  %399 = vmatmul.bf16.vlgmr.msrb.gmra.mxu0 %v165_v0 }
  0xa5   :  { %386 = vmatmul.bf16.vlgmr.msra.gmra.mxu3 %v166_v1  ;;  %412 = vmatmul.bf16.vlgmr.msrb.gmra.mxu1 %v166_v1  ;;  %v148_v2 = vpop.f32.mrf.mxu0 }
  0xa6   :  { %v161_v3 = vpop.f32.mrf.mxu1 }
 0x121   :  { %v400_v12 = vpop.f32.mrf.mxu0 }
 0x122   :  { %v401_v13 = vadd.f32 %v400_v12, %v202_v11  ;;  %v413_v14 = vpop.f32.mrf.mxu1 }
 0x124   :  { %v414_v15 = vadd.f32 %v413_v14, %v401_v13 }
 0x126   :  { %v418_v17 = vmax.f32 %v414_v15, 0.0 }
 0x127   :  { %v374_v18 = vpop.f32.mrf.mxu2 }
 0x128   :  { %v420_v19 = vpack.c.bf16 %v418_v17, %v418_v17  ;;  %v375_v20 = vadd.f32 %v374_v18, %v201_v16  ;;  %v387_v21 = vpop.f32.mrf.mxu3 }
 0x129   :  { %v402_v22 = vpop.f32.mrf.mxu0 }
 0x12a   :  { %v388_v23 = vadd.f32 %v387_v21, %v375_v20  ;;  %v415_v24 = vpop.f32.mrf.mxu1  ;;  %574 = vmatmul.bf16.vlgmr.msrb.gmra.mxu3 %v420_v19 }
 0x12c   :  { %v417_v25 = vmax.f32 %v388_v23, 0.0 }
 0x12e   :  { %v419_v26 = vpack.c.bf16 %v417_v25, %v417_v25 }
 0x12f   :  { %v376_v27 = vpop.f32.mrf.mxu2 }
 0x130   :  { %v389_v28 = vpop.f32.mrf.mxu3  ;;  %561 = vmatmul.bf16.vlgmr.msrb.gmra.mxu2 %v419_v26 }
 0x1ad   :  { %v575_v30 = vpop.f32.mrf.mxu3 }
 0x1b3   :  { %v562_v32 = vpop.f32.mrf.mxu2 }
 0x1b4   :  { %v563_v33 = vadd.f32 %v906_v31, %v562_v32 }
 0x1b5   :  { %v577_v34 = vpop.f32.mrf.mxu3 }
 0x1b6   :  { %v576_v35 = vadd.f32 %v575_v30, %v563_v33 }
 0x1b8   :  { %v580_v36 = vsel %vm579_vm1, %v576_v35, 0.0 }
 0x1b9   :  { %581 = vadd.xlane.f32.xlu0 %v580_v36 }
 0x1bb   :  { %v564_v37 = vpop.f32.mrf.mxu2 }
 0x1cd   :  { %601 = vperm.xlu0 %905, %v576_v35  }
 0x22c   :  { %v582_v42 = vpop.xlane.xlu0 %581 }
 0x22d   :  { %v583_v43 = vrot.slane %v582_v42, 4 }
 0x22f   :  { %v584_v44 = vadd.f32 %v583_v43, %v582_v42 }
 0x231   :  { %v585_v46 = vrot.slane %v584_v44, 2 }
 0x233   :  { %v586_v47 = vadd.f32 %v585_v46, %v584_v44 }
 0x235   :  { %v587_v49 = vrot.slane %v586_v47, 1 }
 0x237   :  { %v588_v50 = vadd.f32 %v587_v49, %v586_v47 }
 0x239   :  { %889 = vpush %v588_v50 }
 0x23a   :  { %891 = vpush %v596_v51 }
 0x23f   :  { %v602_v52 = vpop.permute.xlu0 %601 }
 0x240   :  { %v604_v53 = vadd.f32 %v602_v52, %v576_v35 }
 0x26a   :  { %s890_s6 = spop %889 }
 0x26b   :  { %s892_s28 = spop %891 }
 0x26c   :  { %s598_s8 = smul.f32 %s892_s28, %s890_s6 }
 0x26e   :  { %v605_v54 = vstv %s598_s8 }
 0x26f   :  { %v606_v55 = vsub.f32 %v604_v53, %v605_v54 }
 0x271   :  { %607 = vst.msk [vmem:[#allocation11] sm:$0xff] %vm579_vm1, %v606_v55 }
 0x272   :  { %618 = dma.vmem_to_hbm [thread:$0]  %s614_s30, 128, %s616_s11, [#allocation4]  }
 0x273   :  { %1059 = dma.done.wait [#allocation4], 128  }
 0x274   :  { %1060 = vsyncadd [#allocation4], 4294967168 }
 0x275   :  { %623 = vsyncpa [#allocation3], 1 }
 0x276   :  { %624 = vsyncpa [#allocation6], 1 }
 0x277   :  { %625 = vsyncpa [#allocation9], 1 }
 0x278   :  { %626 = vsyncpa [#allocation4], 1 }

</bundles_post_ra>
